<compile_context>
chip_gen: v6e
topology: v6e:2x2x1
jax: 0.10.0
libtpu: 0.0.40
codegen_flags: <defaults>
</compile_context>

<pallas_src>
import functools

import jax
import jax.numpy as jnp
from jax.experimental import pallas as pl
from jax.experimental.pallas import tpu as pltpu

LANE = 128
_K_TILE_LARGE = 512          # K tile used when num_genes > 2048
_K_SINGLE_BLOCK_MAX = 2048   # below this, enc1 weights are one full block


def _round_up(x, m):
    return (x + m - 1) // m * m


def _k_padded(num_genes):
    """Padded gene count so the enc1 K axis tiles evenly."""
    if num_genes <= _K_SINGLE_BLOCK_MAX:
        return num_genes
    return _round_up(num_genes, _K_TILE_LARGE)


# ----------------------------- Pallas kernel --------------------------------
def _fused_mlp_kernel(x_ref, w1_ref, b1_ref, w2_ref, b2_ref,
                      w3_ref, b3_ref, w4_ref, b4_ref,
                      feat_ref, out_ref, acc_ref):
    """Fused 4-layer MLP.  Grid axis 0 tiles the enc1 reduction (num_genes)."""
    k = pl.program_id(0)

    @pl.when(k == 0)
    def _():
        acc_ref[...] = jnp.zeros_like(acc_ref)

    # enc1 partial matmul: bf16 inputs on the MXU, f32 accumulation in VMEM.
    acc_ref[...] += jnp.dot(x_ref[...], w1_ref[...],
                            preferred_element_type=jnp.float32)

    @pl.when(k == pl.num_programs(0) - 1)
    def _():
        # enc1: bias + ReLU (f32), recast to bf16 for the next MXU op.
        h1 = jnp.maximum(acc_ref[...] + b1_ref[...], 0.0).astype(jnp.bfloat16)

        # enc2: Linear + ReLU
        h2 = jnp.dot(h1, w2_ref[...],
                     preferred_element_type=jnp.float32) + b2_ref[...]
        h2 = jnp.maximum(h2, 0.0).astype(jnp.bfloat16)

        # enc3: Linear (no ReLU)  ->  feat
        feat = jnp.dot(h2, w3_ref[...],
                       preferred_element_type=jnp.float32) + b3_ref[...]
        feat_ref[...] = feat.astype(feat_ref.dtype)

        # classifier: Linear + ReLU, lane-padded output (sliced in wrapper).
        o = jnp.dot(feat.astype(jnp.bfloat16), w4_ref[...],
                    preferred_element_type=jnp.float32) + b4_ref[...]
        out_ref[...] = jnp.maximum(o, 0.0).astype(out_ref.dtype)


# --------------------------- parameter creation ------------------------------
def _init_linear(key, fan_in, fan_out):
    # PyTorch-style init: U(-1/sqrt(fan_in), 1/sqrt(fan_in)).
    kw, kb = jax.random.split(key)
    bound = 1.0 / jnp.sqrt(jnp.float32(fan_in))
    w = jax.random.uniform(kw, (fan_in, fan_out), jnp.float32, -bound, bound)
    b = jax.random.uniform(kb, (fan_out,), jnp.float32, -bound, bound)
    return w, b


def init_params(key, num_genes, num_hiddens, num_clusters):
    """Weights stored pre-transposed [in, out] in bf16; biases (1, out) f32.

    enc1 weight is zero-padded on the gene axis to a multiple of the K tile;
    the classifier weight/bias are zero-padded to a lane-dense (128) width.
    """
    ks = jax.random.split(key, 4)
    w1, b1 = _init_linear(ks[0], num_genes, 1024)          # Linear + ReLU
    w2, b2 = _init_linear(ks[1], 1024, num_hiddens)        # Linear + ReLU
    w3, b3 = _init_linear(ks[2], num_hiddens, num_hiddens)  # Linear
    w4, b4 = _init_linear(ks[3], num_hiddens, num_clusters)  # Linear + ReLU

    k_pad = _k_padded(num_genes)
    if k_pad != num_genes:
        w1 = jnp.zeros((k_pad, 1024), jnp.float32).at[:num_genes, :].set(w1)

    n_pad = _round_up(num_clusters, LANE)
    w4p = jnp.zeros((num_hiddens, n_pad), jnp.float32)
    w4p = w4p.at[:, :num_clusters].set(w4)
    b4p = jnp.zeros((n_pad,), jnp.float32).at[:num_clusters].set(b4)

    return {
        "w1": w1.astype(jnp.bfloat16), "b1": b1.reshape(1, -1),
        "w2": w2.astype(jnp.bfloat16), "b2": b2.reshape(1, -1),
        "w3": w3.astype(jnp.bfloat16), "b3": b3.reshape(1, -1),
        "w4": w4p.astype(jnp.bfloat16), "b4": b4p.reshape(1, -1),
    }


# ------------------------------ forward pass ---------------------------------
@functools.partial(jax.jit, static_argnames=("num_clusters",))
def classification_model_forward(params, x, *, num_clusters):
    w1, b1 = params["w1"], params["b1"]
    w2, b2 = params["w2"], params["b2"]
    w3, b3 = params["w3"], params["b3"]
    w4, b4 = params["w4"], params["b4"]

    M, K = x.shape
    K_pad, H1 = w1.shape            # (num_genes padded, 1024)
    H = w2.shape[1]                 # num_hiddens
    Np = w4.shape[1]                # num_clusters padded to 128

    # Pad batch to a sublane multiple and genes to the K tiling used at init.
    M_pad = max(_round_up(M, 8), 8)
    if (M_pad != M) or (K_pad != K):
        x = jnp.zeros((M_pad, K_pad), x.dtype).at[:M, :K].set(x)
    x_bf = x.astype(jnp.bfloat16)

    k_tile = K_pad if K_pad <= _K_SINGLE_BLOCK_MAX else _K_TILE_LARGE
    num_k = K_pad // k_tile

    feat_p, out_p = pl.pallas_call(
        _fused_mlp_kernel,
        out_shape=(jax.ShapeDtypeStruct((M_pad, H), jnp.float32),
                   jax.ShapeDtypeStruct((M_pad, Np), jnp.float32)),
        grid=(num_k,),
        in_specs=[
            pl.BlockSpec((M_pad, k_tile), lambda k: (0, k)),   # x tile
            pl.BlockSpec((k_tile, H1), lambda k: (k, 0)),      # enc1 W tile
            pl.BlockSpec((1, H1), lambda k: (0, 0)),           # enc1 b
            pl.BlockSpec((H1, H), lambda k: (0, 0)),           # enc2 W
            pl.BlockSpec((1, H), lambda k: (0, 0)),            # enc2 b
            pl.BlockSpec((H, H), lambda k: (0, 0)),            # enc3 W
            pl.BlockSpec((1, H), lambda k: (0, 0)),            # enc3 b
            pl.BlockSpec((H, Np), lambda k: (0, 0)),           # cls W (padded)
            pl.BlockSpec((1, Np), lambda k: (0, 0)),           # cls b (padded)
        ],
        out_specs=(
            pl.BlockSpec((M_pad, H), lambda k: (0, 0)),        # feat
            pl.BlockSpec((M_pad, Np), lambda k: (0, 0)),       # out (padded)
        ),
        scratch_shapes=[pltpu.VMEM((M_pad, H1), jnp.float32)],  # enc1 acc
        compiler_params=pltpu.CompilerParams(
            dimension_semantics=("arbitrary",)),
    )(x_bf, w1, b1, w2, b2, w3, b3, w4, b4)

    feat = feat_p[:M]
    out = out_p[:M, :num_clusters]
    return feat, out


# ---------------------------- pure-JAX reference ------------------------------
def _reference_forward(params, x, num_clusters):
    def lin(h, w, b):
        return h.astype(jnp.float32) @ w.astype(jnp.float32) + b
    h = jax.nn.relu(lin(x.astype(jnp.bfloat16), params["w1"], params["b1"]))
    h = jax.nn.relu(lin(h.astype(jnp.bfloat16), params["w2"], params["b2"]))
    feat = lin(h.astype(jnp.bfloat16), params["w3"], params["b3"])
    out = jax.nn.relu(lin(feat.astype(jnp.bfloat16), params["w4"], params["b4"]))
    return feat, out[:, :num_clusters]


# ---------------------------------- main --------------------------------------
if __name__ == "__main__":
    num_genes, num_hiddens, num_clusters = 256, 128, 16
    batch = 8

    key = jax.random.PRNGKey(0)
    k_params, k_x = jax.random.split(key)

    params = init_params(k_params, num_genes, num_hiddens, num_clusters)
    x = jax.random.normal(k_x, (batch, num_genes), jnp.float32)

    feat, out = classification_model_forward(params, x,
                                             num_clusters=num_clusters)
    jax.block_until_ready((feat, out))

    assert feat.shape == (batch, num_hiddens)
    assert out.shape == (batch, num_clusters)
    assert bool(jnp.all(out >= 0.0))  # final ReLU

    ref_feat, ref_out = _reference_forward(params, x, num_clusters)
    assert bool(jnp.allclose(feat, ref_feat, rtol=1e-2, atol=1e-2))
    assert bool(jnp.allclose(out, ref_out, rtol=1e-2, atol=1e-2))

    print("KERNEL_OK")
</pallas_src>

<mosaic_0001>
module attributes {stable_mosaic.version = 11 : i64} {
  func.func @_fused_mlp_kernel(%arg0: i32, %arg1: memref<8x256xbf16, #tpu.memory_space<vmem>>, %arg2: memref<256x1024xbf16, #tpu.memory_space<vmem>>, %arg3: memref<1x1024xf32, #tpu.memory_space<vmem>>, %arg4: memref<1024x128xbf16, #tpu.memory_space<vmem>>, %arg5: memref<1x128xf32, #tpu.memory_space<vmem>>, %arg6: memref<128x128xbf16, #tpu.memory_space<vmem>>, %arg7: memref<1x128xf32, #tpu.memory_space<vmem>>, %arg8: memref<128x128xbf16, #tpu.memory_space<vmem>>, %arg9: memref<1x128xf32, #tpu.memory_space<vmem>>, %arg10: memref<8x128xf32, #tpu.memory_space<vmem>>, %arg11: memref<8x128xf32, #tpu.memory_space<vmem>>, %arg12: memref<8x1024xf32, #tpu.memory_space<vmem>>) attributes {dimension_semantics = [#tpu.dimension_semantics<arbitrary>], iteration_bounds = array<i64: 1>, scalar_prefetch = 0 : i64, scratch_operands = 1 : i64, tpu.core_type = #tpu.core_type<tc>, window_params = [{transform_indices = @transform_0, window_bounds = array<i64: 8, 256>}, {transform_indices = @transform_1, window_bounds = array<i64: 256, 1024>}, {pipeline_mode = #tpu.pipeline_mode<synchronous>, transform_indices = @transform_2, window_bounds = array<i64: 1, 1024>}, {pipeline_mode = #tpu.pipeline_mode<synchronous>, transform_indices = @transform_3, window_bounds = array<i64: 1024, 128>}, {pipeline_mode = #tpu.pipeline_mode<synchronous>, transform_indices = @transform_4, window_bounds = array<i64: 1, 128>}, {pipeline_mode = #tpu.pipeline_mode<synchronous>, transform_indices = @transform_5, window_bounds = array<i64: 128, 128>}, {pipeline_mode = #tpu.pipeline_mode<synchronous>, transform_indices = @transform_6, window_bounds = array<i64: 1, 128>}, {pipeline_mode = #tpu.pipeline_mode<synchronous>, transform_indices = @transform_7, window_bounds = array<i64: 128, 128>}, {pipeline_mode = #tpu.pipeline_mode<synchronous>, transform_indices = @transform_8, window_bounds = array<i64: 1, 128>}, {pipeline_mode = #tpu.pipeline_mode<synchronous>, transform_indices = @transform_9, window_bounds = array<i64: 8, 128>}, {pipeline_mode = #tpu.pipeline_mode<synchronous>, transform_indices = @transform_10, window_bounds = array<i64: 8, 128>}]} {
    %c0_i32 = arith.constant 0 : i32
    %0 = arith.cmpi eq, %arg0, %c0_i32 : i32
    %1 = arith.extui %0 : i1 to i32
    %c0_i32_0 = arith.constant 0 : i32
    %2 = arith.cmpi ne, %1, %c0_i32_0 : i32
    scf.if %2 {
      %cst_10 = arith.constant 0.000000e+00 : f32
      %12 = vector.broadcast %cst_10 : f32 to vector<8x1024xf32>
      %c0_11 = arith.constant 0 : index
      %c0_12 = arith.constant 0 : index
      %13 = vector.load %arg12[%c0_11, %c0_12] : memref<8x1024xf32, #tpu.memory_space<vmem>>, vector<8x1024xf32>
      tpu.vector_store %arg12[%c0_11, %c0_12], %12 {strides = array<i32>} : memref<8x1024xf32, #tpu.memory_space<vmem>>, vector<8x1024xf32>,
    } else {
    }
    %c0 = arith.constant 0 : index
    %c0_1 = arith.constant 0 : index
    %3 = vector.load %arg12[%c0, %c0_1] : memref<8x1024xf32, #tpu.memory_space<vmem>>, vector<8x1024xf32>
    %c0_2 = arith.constant 0 : index
    %c0_3 = arith.constant 0 : index
    %4 = vector.load %arg1[%c0_2, %c0_3] : memref<8x256xbf16, #tpu.memory_space<vmem>>, vector<8x256xbf16>
    %c0_4 = arith.constant 0 : index
    %c0_5 = arith.constant 0 : index
    %5 = vector.load %arg2[%c0_4, %c0_5] : memref<256x1024xbf16, #tpu.memory_space<vmem>>, vector<256x1024xbf16>
    %cst = arith.constant dense<0.000000e+00> : vector<8x1024xf32>
    %6 = tpu.matmul %4, %5, %cst {dimension_numbers = #tpu.dot_dimension_numbers<[1], [0], [0], [1], [0, 0, 1, 1], [], []>} : vector<8x256xbf16>, vector<256x1024xbf16>, vector<8x1024xf32> -> vector<8x1024xf32>
    %7 = arith.addf %3, %6 : vector<8x1024xf32>
    %c0_6 = arith.constant 0 : index
    %c0_7 = arith.constant 0 : index
    %8 = vector.load %arg12[%c0_6, %c0_7] : memref<8x1024xf32, #tpu.memory_space<vmem>>, vector<8x1024xf32>
    tpu.vector_store %arg12[%c0_6, %c0_7], %7 {strides = array<i32>} : memref<8x1024xf32, #tpu.memory_space<vmem>>, vector<8x1024xf32>,
    %c0_i32_8 = arith.constant 0 : i32
    %9 = arith.cmpi eq, %arg0, %c0_i32_8 : i32
    %10 = arith.extui %9 : i1 to i32
    %c0_i32_9 = arith.constant 0 : i32
    %11 = arith.cmpi ne, %10, %c0_i32_9 : i32
    scf.if %11 {
      %c0_10 = arith.constant 0 : index
      %c0_11 = arith.constant 0 : index
      %12 = vector.load %arg12[%c0_10, %c0_11] : memref<8x1024xf32, #tpu.memory_space<vmem>>, vector<8x1024xf32>
      %c0_12 = arith.constant 0 : index
      %c0_13 = arith.constant 0 : index
      %13 = vector.load %arg3[%c0_12, %c0_13] : memref<1x1024xf32, #tpu.memory_space<vmem>>, vector<1x1024xf32>
      %14 = vector.broadcast %13 : vector<1x1024xf32> to vector<8x1024xf32>
      %15 = arith.addf %12, %14 : vector<8x1024xf32>
      %cst_14 = arith.constant 0.000000e+00 : f32
      %16 = vector.broadcast %cst_14 : f32 to vector<8x1024xf32>
      %17 = arith.maximumf %15, %16 : vector<8x1024xf32>
      %18 = arith.truncf %17 : vector<8x1024xf32> to vector<8x1024xbf16>
      %c0_15 = arith.constant 0 : index
      %c0_16 = arith.constant 0 : index
      %19 = vector.load %arg4[%c0_15, %c0_16] : memref<1024x128xbf16, #tpu.memory_space<vmem>>, vector<1024x128xbf16>
      %cst_17 = arith.constant dense<0.000000e+00> : vector<8x128xf32>
      %20 = tpu.matmul %18, %19, %cst_17 {dimension_numbers = #tpu.dot_dimension_numbers<[1], [0], [0], [1], [0, 0, 1, 1], [], []>} : vector<8x1024xbf16>, vector<1024x128xbf16>, vector<8x128xf32> -> vector<8x128xf32>
      %c0_18 = arith.constant 0 : index
      %c0_19 = arith.constant 0 : index
      %21 = vector.load %arg5[%c0_18, %c0_19] : memref<1x128xf32, #tpu.memory_space<vmem>>, vector<1x128xf32>
      %22 = vector.broadcast %21 : vector<1x128xf32> to vector<8x128xf32>
      %23 = arith.addf %20, %22 : vector<8x128xf32>
      %cst_20 = arith.constant 0.000000e+00 : f32
      %24 = vector.broadcast %cst_20 : f32 to vector<8x128xf32>
      %25 = arith.maximumf %23, %24 : vector<8x128xf32>
      %26 = arith.truncf %25 : vector<8x128xf32> to vector<8x128xbf16>
      %c0_21 = arith.constant 0 : index
      %c0_22 = arith.constant 0 : index
      %27 = vector.load %arg6[%c0_21, %c0_22] : memref<128x128xbf16, #tpu.memory_space<vmem>>, vector<128x128xbf16>
      %cst_23 = arith.constant dense<0.000000e+00> : vector<8x128xf32>
      %28 = tpu.matmul %26, %27, %cst_23 {dimension_numbers = #tpu.dot_dimension_numbers<[1], [0], [0], [1], [0, 0, 1, 1], [], []>} : vector<8x128xbf16>, vector<128x128xbf16>, vector<8x128xf32> -> vector<8x128xf32>
      %c0_24 = arith.constant 0 : index
      %c0_25 = arith.constant 0 : index
      %29 = vector.load %arg7[%c0_24, %c0_25] : memref<1x128xf32, #tpu.memory_space<vmem>>, vector<1x128xf32>
      %30 = vector.broadcast %29 : vector<1x128xf32> to vector<8x128xf32>
      %31 = arith.addf %28, %30 : vector<8x128xf32>
      %c0_26 = arith.constant 0 : index
      %c0_27 = arith.constant 0 : index
      %32 = vector.load %arg10[%c0_26, %c0_27] : memref<8x128xf32, #tpu.memory_space<vmem>>, vector<8x128xf32>
      tpu.vector_store %arg10[%c0_26, %c0_27], %31 {strides = array<i32>} : memref<8x128xf32, #tpu.memory_space<vmem>>, vector<8x128xf32>,
      %33 = arith.truncf %31 : vector<8x128xf32> to vector<8x128xbf16>
      %c0_28 = arith.constant 0 : index
      %c0_29 = arith.constant 0 : index
      %34 = vector.load %arg8[%c0_28, %c0_29] : memref<128x128xbf16, #tpu.memory_space<vmem>>, vector<128x128xbf16>
      %cst_30 = arith.constant dense<0.000000e+00> : vector<8x128xf32>
      %35 = tpu.matmul %33, %34, %cst_30 {dimension_numbers = #tpu.dot_dimension_numbers<[1], [0], [0], [1], [0, 0, 1, 1], [], []>} : vector<8x128xbf16>, vector<128x128xbf16>, vector<8x128xf32> -> vector<8x128xf32>
      %c0_31 = arith.constant 0 : index
      %c0_32 = arith.constant 0 : index
      %36 = vector.load %arg9[%c0_31, %c0_32] : memref<1x128xf32, #tpu.memory_space<vmem>>, vector<1x128xf32>
      %37 = vector.broadcast %36 : vector<1x128xf32> to vector<8x128xf32>
      %38 = arith.addf %35, %37 : vector<8x128xf32>
      %cst_33 = arith.constant 0.000000e+00 : f32
      %39 = vector.broadcast %cst_33 : f32 to vector<8x128xf32>
      %40 = arith.maximumf %38, %39 : vector<8x128xf32>
      %c0_34 = arith.constant 0 : index
      %c0_35 = arith.constant 0 : index
      %41 = vector.load %arg11[%c0_34, %c0_35] : memref<8x128xf32, #tpu.memory_space<vmem>>, vector<8x128xf32>
      tpu.vector_store %arg11[%c0_34, %c0_35], %40 {strides = array<i32>} : memref<8x128xf32, #tpu.memory_space<vmem>>, vector<8x128xf32>,
    } else {
    }
    return
  }
  func.func @transform_0(%arg0: i32) -> (i32, i32) {
    %c0_i32 = arith.constant 0 : i32
    %c0_i32_0 = arith.constant 0 : i32
    return %c0_i32, %arg0 : i32, i32
  }
  func.func @transform_1(%arg0: i32) -> (i32, i32) {
    %c0_i32 = arith.constant 0 : i32
    %c0_i32_0 = arith.constant 0 : i32
    return %arg0, %c0_i32 : i32, i32
  }
  func.func @transform_2(%arg0: i32) -> (i32, i32) {
    %c0_i32 = arith.constant 0 : i32
    %c0_i32_0 = arith.constant 0 : i32
    %c0_i32_1 = arith.constant 0 : i32
    return %c0_i32, %c0_i32_0 : i32, i32
  }
  func.func @transform_3(%arg0: i32) -> (i32, i32) {
    %c0_i32 = arith.constant 0 : i32
    %c0_i32_0 = arith.constant 0 : i32
    %c0_i32_1 = arith.constant 0 : i32
    return %c0_i32, %c0_i32_0 : i32, i32
  }
  func.func @transform_4(%arg0: i32) -> (i32, i32) {
    %c0_i32 = arith.constant 0 : i32
    %c0_i32_0 = arith.constant 0 : i32
    %c0_i32_1 = arith.constant 0 : i32
    return %c0_i32, %c0_i32_0 : i32, i32
  }
  func.func @transform_5(%arg0: i32) -> (i32, i32) {
    %c0_i32 = arith.constant 0 : i32
    %c0_i32_0 = arith.constant 0 : i32
    %c0_i32_1 = arith.constant 0 : i32
    return %c0_i32, %c0_i32_0 : i32, i32
  }
  func.func @transform_6(%arg0: i32) -> (i32, i32) {
    %c0_i32 = arith.constant 0 : i32
    %c0_i32_0 = arith.constant 0 : i32
    %c0_i32_1 = arith.constant 0 : i32
    return %c0_i32, %c0_i32_0 : i32, i32
  }
  func.func @transform_7(%arg0: i32) -> (i32, i32) {
    %c0_i32 = arith.constant 0 : i32
    %c0_i32_0 = arith.constant 0 : i32
    %c0_i32_1 = arith.constant 0 : i32
    return %c0_i32, %c0_i32_0 : i32, i32
  }
  func.func @transform_8(%arg0: i32) -> (i32, i32) {
    %c0_i32 = arith.constant 0 : i32
    %c0_i32_0 = arith.constant 0 : i32
    %c0_i32_1 = arith.constant 0 : i32
    return %c0_i32, %c0_i32_0 : i32, i32
  }
  func.func @transform_9(%arg0: i32) -> (i32, i32) {
    %c0_i32 = arith.constant 0 : i32
    %c0_i32_0 = arith.constant 0 : i32
    %c0_i32_1 = arith.constant 0 : i32
    return %c0_i32, %c0_i32_0 : i32, i32
  }
  func.func @transform_10(%arg0: i32) -> (i32, i32) {
    %c0_i32 = arith.constant 0 : i32
    %c0_i32_0 = arith.constant 0 : i32
    %c0_i32_1 = arith.constant 0 : i32
    return %c0_i32, %c0_i32_0 : i32, i32
  }
}

</mosaic_0001>

<bundles_post_ra>
// kernel: classification_model_forward.1
= control target key start
LH: loop header
LB: loop body
LE: loop exit
PB: predicated region body
PF: predicated region fallthrough
CT: control target
= control target key end

     0   :  { %16 = vsyncpa [#allocation4], 0  ;;  %s2813_s0 = inlined_call_operand.vmem [shape: bf16[8,256], index: 0, kind: input, shape index: {}]   ;;  %s2814_s1 = inlined_call_operand.hbm [shape: bf16[256,1024], index: 1, kind: input, shape index: {}]   ;;  %s2815_s2 = inlined_call_operand.vmem [shape: f32[1,1024], index: 2, kind: input, shape index: {}]   ;;  %s2816_s3 = inlined_call_operand.hbm [shape: bf16[1024,128], index: 3, kind: input, shape index: {}]   ;;  %s2817_s4 = inlined_call_operand.vmem [shape: f32[1,128], index: 4, kind: input, shape index: {}]   ;;  %s2818_s5 = inlined_call_operand.hbm [shape: bf16[128,128], index: 5, kind: input, shape index: {}]   ;;  %s2819_s6 = inlined_call_operand.vmem [shape: f32[1,128], index: 6, kind: input, shape index: {}]   ;;  %s2820_s7 = inlined_call_operand.hbm [shape: bf16[128,128], index: 7, kind: input, shape index: {}]   ;;  %s2821_s8 = inlined_call_operand.vmem [shape: f32[1,128], index: 8, kind: input, shape index: {}]   ;;  %s2822_s9 = inlined_call_operand.hbm [shape: f32[8,128], index: 9, kind: output, shape index: {0}]   ;;  %s2823_s10 = inlined_call_operand.hbm [shape: f32[8,128], index: 10, kind: output, shape index: {1}]  }
   0x1   :  { %17 = vsyncpa [#allocation7], 0 }
   0x2   :  { %18 = vsyncpa [#allocation10], 0 }
   0x3   :  { %19 = vsyncpa [#allocation5], 0 }
   0x4   :  { %20 = vsyncpa [#allocation13], 0  ;;  %s2666_s13 = smov [#allocation6]  }
   0x5   :  { %s42_s14 = sshll.u32 %s2666_s13, 4  ;;  %s43_s14 = int_to_ptr.vmem [resolvable:$true] %s42_s14 }
   0x6   :  { %s2544_s15 = scalar_lea.vmem %s43_s14, 8192  ;;  %p2549_p1 = scmp.lt.s32.totalorder %s43_s14, %s43_s14 }
   0x7   :  { %p2545_p0 = scmp.ne.s32.totalorder %s43_s14, %s2544_s15  ;;  %p2550_p2 = scmp.lt.s32.totalorder %s2544_s15, %s2544_s15 }
   0x9   :  { %p2551_p3 = por %p2550_p2, %p2549_p1 }
   0xb   :  { %p2552_p4 = pnand %p2551_p3, %p2545_p0 }
   0xd   :  { %2555 = shalt.err (!%p2552_p4)
}
   0xe   :  { %s2667_s16 = smov 64   ;;  %s2668_s17 = smov 4  }
   0xf   :  { %48 = dma.hbm_to_vmem [thread:$0]  %s2816_s3, 8192, %s43_s14, [#allocation7], %s2667_s16, %s2667_s16, %s2668_s17  }
  0x10   :  { %s2669_s20 = smov [#allocation3]  }
  0x11   :  { %s28_s21 = sshll.u32 %s2669_s20, 4  ;;  %s29_s21 = int_to_ptr.vmem [resolvable:$true] %s28_s21 }
  0x12   :  { %s2564_s22 = scalar_lea.vmem %s29_s21, 16384  ;;  %p2569_p6 = scmp.lt.s32.totalorder %s29_s21, %s29_s21 }
  0x13   :  { %p2565_p5 = scmp.ne.s32.totalorder %s29_s21, %s2564_s22  ;;  %p2570_p7 = scmp.lt.s32.totalorder %s2564_s22, %s2564_s22 }
  0x15   :  { %p2571_p8 = por %p2570_p7, %p2569_p6 }
  0x17   :  { %p2572_p9 = pnand %p2571_p8, %p2565_p5 }
  0x19   :  { %2575 = shalt.err (!%p2572_p9)
}
  0x1a   :  { %s2670_s23 = smov 512   ;;  %s2671_s24 = smov 32  }
  0x1b   :  { %34 = dma.hbm_to_vmem [thread:$0]  %s2814_s1, 16384, %s29_s21, [#allocation4], %s2670_s23, %s2670_s23, %s2671_s24  }
  0x1c   :  { %s2672_s27 = smov [#allocation8]   ;;  %s2673_s29 = smov [#allocation9]  }
  0x1d   :  { %s56_s28 = sshll.u32 %s2672_s27, 4  ;;  %s70_s3 = sshll.u32 %s2673_s29, 4  ;;  %s57_s28 = int_to_ptr.vmem [resolvable:$true] %s56_s28  ;;  %s71_s3 = int_to_ptr.vmem [resolvable:$true] %s70_s3 }
  0x1e   :  { %s2584_s30 = scalar_lea.vmem %s57_s28, 1024  ;;  %p2589_p11 = scmp.lt.s32.totalorder %s57_s28, %s57_s28 }
  0x1f   :  { %p2585_p10 = scmp.ne.s32.totalorder %s57_s28, %s2584_s30  ;;  %p2590_p12 = scmp.lt.s32.totalorder %s2584_s30, %s2584_s30 }
  0x21   :  { %p2591_p13 = por %p2590_p12, %p2589_p11 }
  0x23   :  { %p2592_p0 = pnand %p2591_p13, %p2585_p10 }
  0x25   :  { %2595 = shalt.err (!%p2592_p0)
}
  0x26   :  { %62 = dma.hbm_to_vmem [thread:$0]  %s2818_s5, 1024, %s57_s28, [#allocation7], %s2667_s16, %s2667_s16, %s2668_s17  }
  0x27   :  { %s2604_s1 = scalar_lea.vmem %s71_s3, 1024  ;;  %p2609_p2 = scmp.lt.s32.totalorder %s71_s3, %s71_s3 }
  0x28   :  { %p2605_p1 = scmp.ne.s32.totalorder %s71_s3, %s2604_s1  ;;  %p2610_p3 = scmp.lt.s32.totalorder %s2604_s1, %s2604_s1 }
  0x2a   :  { %p2611_p4 = por %p2610_p3, %p2609_p2 }
  0x2c   :  { %p2612_p5 = pnand %p2611_p4, %p2605_p1 }
  0x2e   :  { %2615 = shalt.err (!%p2612_p5)
}
  0x2f   :  { %76 = dma.hbm_to_vmem [thread:$0]  %s2820_s7, 1024, %s71_s3, [#allocation10], %s2667_s16, %s2667_s16, %s2668_s17  }
  0x30   :  { %2656 = dma.done.wait [#allocation4], 16384  }
  0x31   :  { %2657 = vsyncadd [#allocation4], 4294950912 }
  0x32   :  { %2658 = dma.done.wait [#allocation7], 9216  }
  0x33   :  { %2659 = vsyncadd [#allocation7], 4294958080 }
  0x34   :  { %2660 = dma.done.wait [#allocation10], 1024  }
  0x35   :  { %2661 = vsyncadd [#allocation10], 4294966272  ;;  %v169_v0 = vld [vmem:[#allocation3 + $0x1c0] sm:$0xff]  ;;  %v170_v2 = vld [vmem:[#allocation3 + $0x1c8] sm:$0xff]  ;;  %vm2675_vm0 = vmmov 0   ;;  %s2676_s18 = smov [#allocation11]  }
  0x36   :  { %v173_v1 = vld [vmem:[#allocation3 + $0x1e0] sm:$0xff]  ;;  %v174_v4 = vld [vmem:[#allocation3 + $0x1e8] sm:$0xff]  ;;  %s2058_s19 = sshll.u32 %s2676_s18, 4  ;;  %s2059_s19 = int_to_ptr.vmem [resolvable:$true] %s2058_s19 }
  0x37   :  { %v2142_v3 = vcombine.high %v169_v0, %v173_v1  ;;  %v2141_v5 = vcombine.low %v169_v0, %v173_v1  ;;  %v161_v6 = vld [vmem:[#allocation3 + $0x180] sm:$0xff]  ;;  %v2144_v8 = vcombine.high %v170_v2, %v174_v4  ;;  %v2143_v9 = vcombine.low %v170_v2, %v174_v4  ;;  %v162_v11 = vld [vmem:[#allocation3 + $0x188] sm:$0xff]  ;;  %s2616_s20 = scalar_lea.vmem %s2059_s19, 128  ;;  %p2621_p7 = scmp.lt.s32.totalorder %s2059_s19, %s2059_s19 }
  0x38   :  { %v165_v7 = vld [vmem:[#allocation3 + $0x1a0] sm:$0xff]  ;;  %v166_v12 = vld [vmem:[#allocation3 + $0x1a8] sm:$0xff]  ;;  %p2617_p6 = scmp.ne.s32.totalorder %s2059_s19, %s2616_s20  ;;  %p2622_p8 = scmp.lt.s32.totalorder %s2616_s20, %s2616_s20 }
  0x39   :  { %v2134_v10 = vcombine.high %v161_v6, %v165_v7  ;;  %v153_v13 = vld [vmem:[#allocation3 + $0x140] sm:$0xff]  ;;  %888 = vmatprep.subr.bf16.mxu0 %v2142_v3  ;;  %v2136_v14 = vcombine.high %v162_v11, %v166_v12  ;;  %v154_v16 = vld [vmem:[#allocation3 + $0x148] sm:$0xff]  ;;  %929 = vmatprep.subr.bf16.mxu1 %v2144_v8  ;;  %v2133_v18 = vcombine.low %v161_v6, %v165_v7 }
  0x3a   :  { %v157_v15 = vld [vmem:[#allocation3 + $0x160] sm:$0xff]  ;;  %v158_v17 = vld [vmem:[#allocation3 + $0x168] sm:$0xff]  ;;  %889 = vmatpush1.bf16.msra.mxu0 %v2141_v5  ;;  %930 = vmatpush1.bf16.msra.mxu1 %v2143_v9  ;;  %v2135_v19 = vcombine.low %v162_v11, %v166_v12  ;;  %p2623_p9 = por %p2622_p8, %p2621_p7 }
  0x3b   :  { %890 = vmatprep.subr.bf16.mxu0 %v2134_v10  ;;  %v2126_v20 = vcombine.high %v153_v13, %v157_v15  ;;  %931 = vmatprep.subr.bf16.mxu1 %v2136_v14  ;;  %v2128_v21 = vcombine.high %v154_v16, %v158_v17  ;;  %v145_v22 = vld [vmem:[#allocation3 + $0x100] sm:$0xff]  ;;  %v146_v24 = vld [vmem:[#allocation3 + $0x108] sm:$0xff]  ;;  %v2125_v26 = vcombine.low %v153_v13, %v157_v15 }
  0x3c   :  { %v149_v23 = vld [vmem:[#allocation3 + $0x120] sm:$0xff]  ;;  %v150_v25 = vld [vmem:[#allocation3 + $0x128] sm:$0xff]  ;;  %v2127_v27 = vcombine.low %v154_v16, %v158_v17  ;;  %p2624_p10 = pnand %p2623_p9, %p2617_p6 }
  0x3d   :  { %v2118_v28 = vcombine.high %v145_v22, %v149_v23  ;;  %v2120_v29 = vcombine.high %v146_v24, %v150_v25  ;;  %v137_v30 = vld [vmem:[#allocation3 + $0xc0] sm:$0xff]  ;;  %v138_v32 = vld [vmem:[#allocation3 + $0xc8] sm:$0xff]  ;;  %v2117_v34 = vcombine.low %v145_v22, %v149_v23  ;;  %v2119_v35 = vcombine.low %v146_v24, %v150_v25 }
  0x3e   :  { %891 = vmatpush1.bf16.msra.mxu0 %v2133_v18  ;;  %932 = vmatpush1.bf16.msra.mxu1 %v2135_v19  ;;  %v141_v31 = vld [vmem:[#allocation3 + $0xe0] sm:$0xff]  ;;  %v142_v33 = vld [vmem:[#allocation3 + $0xe8] sm:$0xff] }
  0x3f   :  { %892 = vmatprep.subr.bf16.mxu0 %v2126_v20  ;;  %933 = vmatprep.subr.bf16.mxu1 %v2128_v21  ;;  %v2110_v36 = vcombine.high %v137_v30, %v141_v31  ;;  %v2112_v37 = vcombine.high %v138_v32, %v142_v33  ;;  %v129_v38 = vld [vmem:[#allocation3 + $0x80] sm:$0xff]  ;;  %v130_v40 = vld [vmem:[#allocation3 + $0x88] sm:$0xff]  ;;  %v2109_v42 = vcombine.low %v137_v30, %v141_v31 }
  0x40   :  { %v133_v39 = vld [vmem:[#allocation3 + $0xa0] sm:$0xff]  ;;  %v134_v41 = vld [vmem:[#allocation3 + $0xa8] sm:$0xff]  ;;  %v2111_v43 = vcombine.low %v138_v32, %v142_v33 }
  0x41   :  { %v2102_v44 = vcombine.high %v129_v38, %v133_v39  ;;  %v2104_v45 = vcombine.high %v130_v40, %v134_v41  ;;  %v121_v46 = vld [vmem:[#allocation3 + $0x40] sm:$0xff]  ;;  %v122_v48 = vld [vmem:[#allocation3 + $0x48] sm:$0xff]  ;;  %v2101_v50 = vcombine.low %v129_v38, %v133_v39  ;;  %v2103_v51 = vcombine.low %v130_v40, %v134_v41 }
  0x42   :  { %893 = vmatpush1.bf16.msra.mxu0 %v2125_v26  ;;  %934 = vmatpush1.bf16.msra.mxu1 %v2127_v27  ;;  %v125_v47 = vld [vmem:[#allocation3 + $0x60] sm:$0xff]  ;;  %v126_v49 = vld [vmem:[#allocation3 + $0x68] sm:$0xff] }
  0x43   :  { %894 = vmatprep.subr.bf16.mxu0 %v2118_v28  ;;  %935 = vmatprep.subr.bf16.mxu1 %v2120_v29  ;;  %v2094_v52 = vcombine.high %v121_v46, %v125_v47  ;;  %v2757_v53 = vld [vmem:[%s2813_s0] sm:$0xff]  ;;  %v2096_v54 = vcombine.high %v122_v48, %v126_v49  ;;  %v114_v58 = vld [vmem:[#allocation3 + $0x8] sm:$0xff]  ;;  %v2093_v60 = vcombine.low %v121_v46, %v125_v47 }
  0x44   :  { %v113_v55 = vld [vmem:[#allocation3] sm:$0xff]  ;;  %v2761_v57 = vcombine.high %v2757_v53, %v2757_v53  ;;  %v118_v59 = vld [vmem:[#allocation3 + $0x28] sm:$0xff]  ;;  %v2095_v61 = vcombine.low %v122_v48, %v126_v49 }
  0x45   :  { %v117_v56 = vld [vmem:[#allocation3 + $0x20] sm:$0xff]  ;;  %v2088_v63 = vcombine.high %v114_v58, %v118_v59  ;;  %v234_v2 = vld [vmem:[#allocation3 + $0x3c8] sm:$0xff]  ;;  %v2087_v5 = vcombine.low %v114_v58, %v118_v59 }
  0x46   :  { %895 = vmatpush1.bf16.msra.mxu0 %v2117_v34  ;;  %936 = vmatpush1.bf16.msra.mxu1 %v2119_v35  ;;  %v2086_v62 = vcombine.high %v113_v55, %v117_v56  ;;  %v233_v0 = vld [vmem:[#allocation3 + $0x3c0] sm:$0xff]  ;;  %v238_v3 = vld [vmem:[#allocation3 + $0x3e8] sm:$0xff]  ;;  %v2085_v4 = vcombine.low %v113_v55, %v117_v56 }
  0x47   :  { %896 = vmatprep.subr.bf16.mxu0 %v2110_v36  ;;  %937 = vmatprep.subr.bf16.mxu1 %v2112_v37  ;;  %v237_v1 = vld [vmem:[#allocation3 + $0x3e0] sm:$0xff]  ;;  %v2208_v7 = vcombine.high %v234_v2, %v238_v3  ;;  %v226_v10 = vld [vmem:[#allocation3 + $0x388] sm:$0xff]  ;;  %v2207_v13 = vcombine.low %v234_v2, %v238_v3  ;;  %v175_v2 = vld [vmem:[#allocation3 + $0x1f0] sm:$0xff] }
  0x48   :  { %920 = vmatprep.mubr.bf16.mxu0 %v2761_v57  ;;  %961 = vmatprep.mubr.bf16.mxu1 %v2761_v57  ;;  %v2206_v6 = vcombine.high %v233_v0, %v237_v1  ;;  %v225_v8 = vld [vmem:[#allocation3 + $0x380] sm:$0xff]  ;;  %v230_v11 = vld [vmem:[#allocation3 + $0x3a8] sm:$0xff]  ;;  %v2205_v12 = vcombine.low %v233_v0, %v237_v1 }
  0x49   :  { %v229_v9 = vld [vmem:[#allocation3 + $0x3a0] sm:$0xff]  ;;  %v2200_v15 = vcombine.high %v226_v10, %v230_v11  ;;  %v218_v18 = vld [vmem:[#allocation3 + $0x348] sm:$0xff]  ;;  %v2199_v21 = vcombine.low %v226_v10, %v230_v11  ;;  %v167_v10 = vld [vmem:[#allocation3 + $0x1b0] sm:$0xff] }
  0x4a   :  { %897 = vmatpush1.bf16.msra.mxu0 %v2109_v42  ;;  %938 = vmatpush1.bf16.msra.mxu1 %v2111_v43  ;;  %v2198_v14 = vcombine.high %v225_v8, %v229_v9  ;;  %v217_v16 = vld [vmem:[#allocation3 + $0x340] sm:$0xff]  ;;  %v222_v19 = vld [vmem:[#allocation3 + $0x368] sm:$0xff]  ;;  %v2197_v20 = vcombine.low %v225_v8, %v229_v9 }
  0x4b   :  { %898 = vmatprep.subr.bf16.mxu0 %v2102_v44  ;;  %939 = vmatprep.subr.bf16.mxu1 %v2104_v45  ;;  %v221_v17 = vld [vmem:[#allocation3 + $0x360] sm:$0xff]  ;;  %v2192_v23 = vcombine.high %v218_v18, %v222_v19  ;;  %v210_v26 = vld [vmem:[#allocation3 + $0x308] sm:$0xff]  ;;  %v2191_v29 = vcombine.low %v218_v18, %v222_v19 }
  0x4c   :  { %v2190_v22 = vcombine.high %v217_v16, %v221_v17  ;;  %v209_v24 = vld [vmem:[#allocation3 + $0x300] sm:$0xff]  ;;  %v214_v27 = vld [vmem:[#allocation3 + $0x328] sm:$0xff]  ;;  %v2189_v28 = vcombine.low %v217_v16, %v221_v17  ;;  %v155_v16 = vld [vmem:[#allocation3 + $0x150] sm:$0xff] }
  0x4d   :  { %v213_v25 = vld [vmem:[#allocation3 + $0x320] sm:$0xff]  ;;  %v2184_v31 = vcombine.high %v210_v26, %v214_v27  ;;  %v202_v34 = vld [vmem:[#allocation3 + $0x2c8] sm:$0xff]  ;;  %v2183_v38 = vcombine.low %v210_v26, %v214_v27  ;;  %v159_v17 = vld [vmem:[#allocation3 + $0x170] sm:$0xff] }
  0x4e   :  { %899 = vmatpush1.bf16.msra.mxu0 %v2101_v50  ;;  %940 = vmatpush1.bf16.msra.mxu1 %v2103_v51  ;;  %v2182_v30 = vcombine.high %v209_v24, %v213_v25  ;;  %v201_v32 = vld [vmem:[#allocation3 + $0x2c0] sm:$0xff]  ;;  %v206_v35 = vld [vmem:[#allocation3 + $0x2e8] sm:$0xff]  ;;  %v2181_v36 = vcombine.low %v209_v24, %v213_v25  ;;  %v151_v24 = vld [vmem:[#allocation3 + $0x130] sm:$0xff]  ;;  %v2130_v26 = vcombine.high %v155_v16, %v159_v17 }
  0x4f   :  { %900 = vmatprep.subr.bf16.mxu0 %v2094_v52  ;;  %941 = vmatprep.subr.bf16.mxu1 %v2096_v54  ;;  %v205_v33 = vld [vmem:[#allocation3 + $0x2e0] sm:$0xff]  ;;  %v2176_v41 = vcombine.high %v202_v34, %v206_v35  ;;  %v194_v42 = vld [vmem:[#allocation3 + $0x288] sm:$0xff]  ;;  %v2175_v46 = vcombine.low %v202_v34, %v206_v35  ;;  %v148_v27 = vld [vmem:[#allocation3 + $0x118] sm:$0xff] }
  0x50   :  { %v193_v37 = vld [vmem:[#allocation3 + $0x280] sm:$0xff]  ;;  %v2174_v39 = vcombine.high %v201_v32, %v205_v33  ;;  %v198_v43 = vld [vmem:[#allocation3 + $0x2a8] sm:$0xff]  ;;  %v2173_v44 = vcombine.low %v201_v32, %v205_v33  ;;  %v143_v32 = vld [vmem:[#allocation3 + $0xf0] sm:$0xff] }
  0x51   :  { %v197_v40 = vld [vmem:[#allocation3 + $0x2a0] sm:$0xff]  ;;  %v2168_v49 = vcombine.high %v194_v42, %v198_v43  ;;  %v186_v50 = vld [vmem:[#allocation3 + $0x248] sm:$0xff]  ;;  %v2167_v55 = vcombine.low %v194_v42, %v198_v43  ;;  %v140_v35 = vld [vmem:[#allocation3 + $0xd8] sm:$0xff] }
  0x52   :  { %901 = vmatpush1.bf16.msra.mxu0 %v2093_v60  ;;  %942 = vmatpush1.bf16.msra.mxu1 %v2095_v61  ;;  %v185_v45 = vld [vmem:[#allocation3 + $0x240] sm:$0xff]  ;;  %v2166_v47 = vcombine.high %v193_v37, %v197_v40  ;;  %v190_v51 = vld [vmem:[#allocation3 + $0x268] sm:$0xff]  ;;  %v2165_v52 = vcombine.low %v193_v37, %v197_v40  ;;  %v135_v40 = vld [vmem:[#allocation3 + $0xb0] sm:$0xff] }
  0x53   :  { %902 = vmatprep.subr.bf16.mxu0 %v2086_v62  ;;  %943 = vmatprep.subr.bf16.mxu1 %v2088_v63  ;;  %v189_v48 = vld [vmem:[#allocation3 + $0x260] sm:$0xff]  ;;  %v2160_v59 = vcombine.high %v186_v50, %v190_v51  ;;  %v178_v60 = vld [vmem:[#allocation3 + $0x208] sm:$0xff]  ;;  %v171_v63 = vld [vmem:[#allocation3 + $0x1d0] sm:$0xff]  ;;  %v2159_v0 = vcombine.low %v186_v50, %v190_v51 }
  0x54   :  { %v177_v54 = vld [vmem:[#allocation3 + $0x200] sm:$0xff]  ;;  %v2158_v56 = vcombine.high %v185_v45, %v189_v48  ;;  %v182_v61 = vld [vmem:[#allocation3 + $0x228] sm:$0xff]  ;;  %v2157_v62 = vcombine.low %v185_v45, %v189_v48  ;;  %v2146_v9 = vcombine.high %v171_v63, %v175_v2  ;;  %v132_v42 = vld [vmem:[#allocation3 + $0x98] sm:$0xff] }
  0x55   :  { %v181_v58 = vld [vmem:[#allocation3 + $0x220] sm:$0xff]  ;;  %v2152_v3 = vcombine.high %v178_v60, %v182_v61  ;;  %v2151_v8 = vcombine.low %v178_v60, %v182_v61  ;;  %v136_v43 = vld [vmem:[#allocation3 + $0xb8] sm:$0xff] }
  0x56   :  { %903 = vmatpush1.bf16.msra.mxu0 %v2085_v4  ;;  %944 = vmatpush1.bf16.msra.mxu1 %v2087_v5  ;;  %v2150_v1 = vcombine.high %v177_v54, %v181_v58  ;;  %v172_v4 = vld [vmem:[#allocation3 + $0x1d8] sm:$0xff] }
  0x57   :  { %904 = vmatprep.subr.bf16.mxu0 %v2206_v6  ;;  %945 = vmatprep.subr.bf16.mxu1 %v2208_v7  ;;  %v176_v5 = vld [vmem:[#allocation3 + $0x1f8] sm:$0xff]  ;;  %v2149_v6 = vcombine.low %v177_v54, %v181_v58  ;;  %v163_v7 = vld [vmem:[#allocation3 + $0x190] sm:$0xff]  ;;  %v2107_v58 = vcombine.low %v132_v42, %v136_v43 }
  0x58   :  { %v2148_v11 = vcombine.high %v172_v4, %v176_v5  ;;  %v2147_v18 = vcombine.low %v172_v4, %v176_v5  ;;  %v2138_v19 = vcombine.high %v163_v7, %v167_v10  ;;  %v124_v50 = vld [vmem:[#allocation3 + $0x58] sm:$0xff] }
  0x59   :  { %v128_v51 = vld [vmem:[#allocation3 + $0x78] sm:$0xff] }
  0x5a   :  { %905 = vmatpush2.bf16.msra.mxu0 %v2205_v12  ;;  %946 = vmatpush2.bf16.msra.mxu1 %v2207_v13  ;;  %v164_v12 = vld [vmem:[#allocation3 + $0x198] sm:$0xff]  ;;  %v2767_v13 = vcombine.low %v2757_v53, %v2757_v53  ;;  %v2137_v53 = vcombine.low %v163_v7, %v167_v10 }
  0x5b   :  { %906 = vmatprep.subr.bf16.mxu0 %v2198_v14  ;;  %947 = vmatprep.subr.bf16.mxu1 %v2200_v15  ;;  %v168_v14 = vld [vmem:[#allocation3 + $0x1b8] sm:$0xff]  ;;  %v2145_v15 = vcombine.low %v171_v63, %v175_v2  ;;  %v2099_v2 = vcombine.low %v124_v50, %v128_v51 }
  0x5c   :  { %v2139_v25 = vcombine.low %v164_v12, %v168_v14  ;;  %v116_v60 = vld [vmem:[#allocation3 + $0x18] sm:$0xff] }
  0x5d   :  { %v120_v61 = vld [vmem:[#allocation3 + $0x38] sm:$0xff] }
  0x5e   :  { %907 = vmatpush2.bf16.msra.mxu0 %v2197_v20  ;;  %948 = vmatpush2.bf16.msra.mxu1 %v2199_v21  ;;  %v156_v20 = vld [vmem:[#allocation3 + $0x158] sm:$0xff]  ;;  %v2140_v21 = vcombine.high %v164_v12, %v168_v14  ;;  %v2091_v10 = vcombine.low %v116_v60, %v120_v61 }
  0x5f   :  { %908 = vmatprep.subr.bf16.mxu0 %v2190_v22  ;;  %949 = vmatprep.subr.bf16.mxu1 %v2192_v23  ;;  %v160_v22 = vld [vmem:[#allocation3 + $0x178] sm:$0xff]  ;;  %v147_v23 = vld [vmem:[#allocation3 + $0x110] sm:$0xff] }
  0x60   :  { %v2131_v33 = vcombine.low %v156_v20, %v160_v22  ;;  %v2122_v34 = vcombine.high %v147_v23, %v151_v24  ;;  %v236_v4 = vld [vmem:[#allocation3 + $0x3d8] sm:$0xff] }
  0x61   :  { %v240_v5 = vld [vmem:[#allocation3 + $0x3f8] sm:$0xff] }
  0x62   :  { %909 = vmatpush2.bf16.msra.mxu0 %v2189_v28  ;;  %950 = vmatpush2.bf16.msra.mxu1 %v2191_v29  ;;  %v152_v28 = vld [vmem:[#allocation3 + $0x138] sm:$0xff]  ;;  %v2132_v29 = vcombine.high %v156_v20, %v160_v22 }
  0x63   :  { %910 = vmatprep.subr.bf16.mxu0 %v2182_v30  ;;  %951 = vmatprep.subr.bf16.mxu1 %v2184_v31  ;;  %v2129_v30 = vcombine.low %v155_v16, %v159_v17  ;;  %v139_v31 = vld [vmem:[#allocation3 + $0xd0] sm:$0xff]  ;;  %v2124_v37 = vcombine.high %v148_v27, %v152_v28  ;;  %v228_v12 = vld [vmem:[#allocation3 + $0x398] sm:$0xff] }
  0x64   :  { %v2113_v45 = vcombine.low %v139_v31, %v143_v32  ;;  %v232_v14 = vld [vmem:[#allocation3 + $0x3b8] sm:$0xff]  ;;  %v219_v17 = vld [vmem:[#allocation3 + $0x350] sm:$0xff] }
  0x65   :  { %v224_v22 = vld [vmem:[#allocation3 + $0x378] sm:$0xff] }
  0x66   :  { %911 = vmatpush2.bf16.msra.mxu0 %v2181_v36  ;;  %952 = vmatpush2.bf16.msra.mxu1 %v2183_v38  ;;  %v144_v36 = vld [vmem:[#allocation3 + $0xf8] sm:$0xff]  ;;  %v2121_v38 = vcombine.low %v147_v23, %v151_v24  ;;  %v211_v24 = vld [vmem:[#allocation3 + $0x310] sm:$0xff] }
  0x67   :  { %912 = vmatprep.subr.bf16.mxu0 %v2174_v39  ;;  %953 = vmatprep.subr.bf16.mxu1 %v2176_v41  ;;  %v131_v39 = vld [vmem:[#allocation3 + $0x90] sm:$0xff]  ;;  %v2123_v41 = vcombine.low %v148_v27, %v152_v28  ;;  %v2115_v48 = vcombine.low %v140_v35, %v144_v36  ;;  %v212_v28 = vld [vmem:[#allocation3 + $0x318] sm:$0xff] }
  0x68   :  { %v2105_v54 = vcombine.low %v131_v39, %v135_v40 }
  0x6a   :  { %913 = vmatpush2.bf16.msra.mxu0 %v2173_v44  ;;  %954 = vmatpush2.bf16.msra.mxu1 %v2175_v46  ;;  %v2116_v44 = vcombine.high %v140_v35, %v144_v36  ;;  %v123_v46 = vld [vmem:[#allocation3 + $0x50] sm:$0xff] }
  0x6b   :  { %914 = vmatprep.subr.bf16.mxu0 %v2166_v47  ;;  %955 = vmatprep.subr.bf16.mxu1 %v2168_v49  ;;  %v127_v47 = vld [vmem:[#allocation3 + $0x70] sm:$0xff]  ;;  %v2106_v49 = vcombine.high %v131_v39, %v135_v40 }
  0x6c   :  { %v2097_v63 = vcombine.low %v123_v46, %v127_v47  ;;  %v203_v35 = vld [vmem:[#allocation3 + $0x2d0] sm:$0xff] }
  0x6d   :  { %v207_v36 = vld [vmem:[#allocation3 + $0x2f0] sm:$0xff] }
  0x6e   :  { %915 = vmatpush2.bf16.msra.mxu0 %v2165_v52  ;;  %956 = vmatpush2.bf16.msra.mxu1 %v2167_v55  ;;  %v2108_v52 = vcombine.high %v132_v42, %v136_v43  ;;  %v115_v55 = vld [vmem:[#allocation3 + $0x10] sm:$0xff] }
  0x6f   :  { %916 = vmatprep.subr.bf16.mxu0 %v2158_v56  ;;  %957 = vmatprep.subr.bf16.mxu1 %v2160_v59  ;;  %v119_v56 = vld [vmem:[#allocation3 + $0x30] sm:$0xff]  ;;  %v2098_v59 = vcombine.high %v123_v46, %v127_v47  ;;  %v2177_v46 = vcombine.low %v203_v35, %v207_v36 }
  0x70   :  { %v2089_v7 = vcombine.low %v115_v55, %v119_v56  ;;  %v195_v42 = vld [vmem:[#allocation3 + $0x290] sm:$0xff] }
  0x71   :  { %v199_v43 = vld [vmem:[#allocation3 + $0x2b0] sm:$0xff] }
  0x72   :  { %917 = vmatpush2.bf16.msra.mxu0 %v2157_v62  ;;  %958 = vmatpush2.bf16.msra.mxu1 %v2159_v0  ;;  %v2100_v62 = vcombine.high %v124_v50, %v128_v51  ;;  %v235_v0 = vld [vmem:[#allocation3 + $0x3d0] sm:$0xff] }
  0x73   :  { %918 = vmatprep.subr.bf16.mxu0 %v2150_v1  ;;  %959 = vmatprep.subr.bf16.mxu1 %v2152_v3  ;;  %v239_v1 = vld [vmem:[#allocation3 + $0x3f0] sm:$0xff]  ;;  %v2090_v3 = vcombine.high %v115_v55, %v119_v56  ;;  %v2169_v55 = vcombine.low %v195_v42, %v199_v43 }
  0x74   :  { %v2209_v16 = vcombine.low %v235_v0, %v239_v1  ;;  %v187_v50 = vld [vmem:[#allocation3 + $0x250] sm:$0xff] }
  0x75   :  { %v191_v51 = vld [vmem:[#allocation3 + $0x270] sm:$0xff] }
  0x76   :  { %919 = vmatpush2.bf16.msra.mxu0 %v2149_v6  ;;  %960 = vmatpush2.bf16.msra.mxu1 %v2151_v8  ;;  %v2092_v6 = vcombine.high %v116_v60, %v120_v61  ;;  %v227_v8 = vld [vmem:[#allocation3 + $0x390] sm:$0xff] }
  0x77   :  { %970 = vmatprep.subr.bf16.mxu0 %v2146_v9  ;;  %1011 = vmatprep.subr.bf16.mxu1 %v2148_v11  ;;  %v231_v9 = vld [vmem:[#allocation3 + $0x3b0] sm:$0xff]  ;;  %v2210_v11 = vcombine.high %v235_v0, %v239_v1  ;;  %v2161_v0 = vcombine.low %v187_v50, %v191_v51 }
  0x78   :  { %v2202_v20 = vcombine.high %v227_v8, %v231_v9  ;;  %v2201_v23 = vcombine.low %v227_v8, %v231_v9  ;;  %v179_v60 = vld [vmem:[#allocation3 + $0x210] sm:$0xff]  ;;  %v2458_v8 = vld [vmem:[#allocation6 + $0x38] sm:$0xff]  }
  0x79   :  { %921 = vmatmul.mubr.bf16.vlgmr.msra.gmra.mxu0 %v2767_v13  ;;  %962 = vmatmul.mubr.bf16.vlgmr.msra.gmra.mxu1 %v2767_v13  ;;  %v183_v61 = vld [vmem:[#allocation3 + $0x230] sm:$0xff]  ;;  %v2459_v9 = vld [vmem:[#allocation6 + $0xb8] sm:$0xff]  }
  0x7a   :  { %971 = vmatpush1.bf16.msra.mxu0 %v2145_v15  ;;  %1012 = vmatpush1.bf16.msra.mxu1 %v2147_v18  ;;  %v2212_v15 = vcombine.high %v236_v4, %v240_v5  ;;  %v223_v18 = vld [vmem:[#allocation3 + $0x370] sm:$0xff] }
  0x7b   :  { %972 = vmatprep.subr.bf16.mxu0 %v2138_v19  ;;  %1013 = vmatprep.subr.bf16.mxu1 %v2140_v21  ;;  %v2211_v19 = vcombine.low %v236_v4, %v240_v5  ;;  %v220_v21 = vld [vmem:[#allocation3 + $0x358] sm:$0xff]  ;;  %v2194_v27 = vcombine.high %v219_v17, %v223_v18  ;;  %v2153_v4 = vcombine.low %v179_v60, %v183_v61 }
  0x7c   :  { %1002 = vmatprep.mubr.bf16.mxu0 %v2761_v57  ;;  %1043 = vmatprep.mubr.bf16.mxu1 %v2761_v57  ;;  %v2114_v57 = vcombine.high %v139_v31, %v143_v32  ;;  %v2193_v31 = vcombine.low %v219_v17, %v223_v18  ;;  %v2195_v32 = vcombine.low %v220_v21, %v224_v22  ;;  %v2466_v17 = vld [vmem:[#allocation6 + $0x28] sm:$0xff]  }
  0x7d   :  { %v2467_v18 = vld [vmem:[#allocation6 + $0xa8] sm:$0xff]  }
  0x7e   :  { %973 = vmatpush1.bf16.msra.mxu0 %v2137_v53  ;;  %1014 = vmatpush1.bf16.msra.mxu1 %v2139_v25  ;;  %v2204_v53 = vcombine.high %v228_v12, %v232_v14  ;;  %v215_v25 = vld [vmem:[#allocation3 + $0x330] sm:$0xff] }
  0x7f   :  { %974 = vmatprep.subr.bf16.mxu0 %v2130_v26  ;;  %1015 = vmatprep.subr.bf16.mxu1 %v2132_v29  ;;  %v2203_v26 = vcombine.low %v228_v12, %v232_v14  ;;  %v216_v29 = vld [vmem:[#allocation3 + $0x338] sm:$0xff]  ;;  %v2185_v39 = vcombine.low %v211_v24, %v215_v25  ;;  %v2462_v12 = vld [vmem:[#allocation6 + $0x30] sm:$0xff]  }
  0x80   :  { %v2187_v40 = vcombine.low %v212_v28, %v216_v29  ;;  %v2463_v14 = vld [vmem:[#allocation6 + $0xb0] sm:$0xff]  }
  0x82   :  { %975 = vmatpush1.bf16.msra.mxu0 %v2129_v30  ;;  %1016 = vmatpush1.bf16.msra.mxu1 %v2131_v33  ;;  %v2196_v30 = vcombine.high %v220_v21, %v224_v22  ;;  %v2186_v33 = vcombine.high %v211_v24, %v215_v25  ;;  %v2470_v21 = vld [vmem:[#allocation6 + $0x20] sm:$0xff]   ;;  %v2472_v22 = vld [vmem:[#allocation6 + $0x58] sm:$0xff]   ;;  %v2476_v25 = vld [vmem:[#allocation6 + $0x50] sm:$0xff]  }
  0x83   :  { %976 = vmatprep.subr.bf16.mxu0 %v2122_v34  ;;  %1017 = vmatprep.subr.bf16.mxu1 %v2124_v37  ;;  %v2188_v34 = vcombine.high %v212_v28, %v216_v29  ;;  %v204_v37 = vld [vmem:[#allocation3 + $0x2d8] sm:$0xff]  ;;  %v2479_v28 = vld [vmem:[#allocation6 + $0x90] sm:$0xff]   ;;  %v2480_v29 = vld [vmem:[#allocation6 + $0x48] sm:$0xff]  }
  0x84   :  { %v2475_v24 = vld [vmem:[#allocation6 + $0x98] sm:$0xff]  }
  0x86   :  { %977 = vmatpush1.bf16.msra.mxu0 %v2121_v38  ;;  %1018 = vmatpush1.bf16.msra.mxu1 %v2123_v41  ;;  %v208_v38 = vld [vmem:[#allocation3 + $0x2f8] sm:$0xff]  ;;  %v2178_v41 = vcombine.high %v203_v35, %v207_v36  ;;  %v2486_v35 = vld [vmem:[#allocation6] sm:$0xff]  }
  0x87   :  { %978 = vmatprep.subr.bf16.mxu0 %v2114_v57  ;;  %1019 = vmatprep.subr.bf16.mxu1 %v2116_v44  ;;  %v2180_v57 = vcombine.high %v204_v37, %v208_v38  ;;  %v196_v44 = vld [vmem:[#allocation3 + $0x298] sm:$0xff]  ;;  %v2179_v47 = vcombine.low %v204_v37, %v208_v38  ;;  %v2487_v36 = vld [vmem:[#allocation6 + $0x80] sm:$0xff]  }
  0x88   :  { %v2488_v37 = vld [vmem:[#allocation6 + $0x178] sm:$0xff]  }
  0x89   :  { %v2489_v38 = vld [vmem:[#allocation6 + $0x1f8] sm:$0xff]  }
  0x8a   :  { %979 = vmatpush1.bf16.msra.mxu0 %v2113_v45  ;;  %1020 = vmatpush1.bf16.msra.mxu1 %v2115_v48  ;;  %v200_v45 = vld [vmem:[#allocation3 + $0x2b8] sm:$0xff]  ;;  %v2170_v48 = vcombine.high %v195_v42, %v199_v43 }
  0x8b   :  { %980 = vmatprep.subr.bf16.mxu0 %v2106_v49  ;;  %1021 = vmatprep.subr.bf16.mxu1 %v2108_v52  ;;  %v2172_v49 = vcombine.high %v196_v44, %v200_v45  ;;  %v188_v52 = vld [vmem:[#allocation3 + $0x258] sm:$0xff]  ;;  %v2171_v56 = vcombine.low %v196_v44, %v200_v45 }
  0x8e   :  { %981 = vmatpush1.bf16.msra.mxu0 %v2105_v54  ;;  %1022 = vmatpush1.bf16.msra.mxu1 %v2107_v58  ;;  %v192_v54 = vld [vmem:[#allocation3 + $0x278] sm:$0xff]  ;;  %v2162_v58 = vcombine.high %v187_v50, %v191_v51 }
  0x8f   :  { %982 = vmatprep.subr.bf16.mxu0 %v2098_v59  ;;  %1023 = vmatprep.subr.bf16.mxu1 %v2100_v62  ;;  %v2164_v59 = vcombine.high %v188_v52, %v192_v54  ;;  %v180_v62 = vld [vmem:[#allocation3 + $0x218] sm:$0xff]  ;;  %v2163_v1 = vcombine.low %v188_v52, %v192_v54 }
  0x92   :  { %983 = vmatpush1.bf16.msra.mxu0 %v2097_v63  ;;  %1024 = vmatpush1.bf16.msra.mxu1 %v2099_v2  ;;  %v184_v63 = vld [vmem:[#allocation3 + $0x238] sm:$0xff]  ;;  %v2154_v2 = vcombine.high %v179_v60, %v183_v61 }
  0x93   :  { %984 = vmatprep.subr.bf16.mxu0 %v2090_v3  ;;  %1025 = vmatprep.subr.bf16.mxu1 %v2092_v6  ;;  %v2156_v3 = vcombine.high %v180_v62, %v184_v63  ;;  %v2155_v5 = vcombine.low %v180_v62, %v184_v63  ;;  %v2456_v6 = vld [vmem:[#allocation6 + $0x78] sm:$0xff]  }
  0x96   :  { %985 = vmatpush1.bf16.msra.mxu0 %v2089_v7  ;;  %1026 = vmatpush1.bf16.msra.mxu1 %v2091_v10  ;;  %v2457_v7 = vld [vmem:[#allocation6 + $0xf8] sm:$0xff]   ;;  %v2460_v10 = vld [vmem:[#allocation6 + $0x70] sm:$0xff]  }
  0x97   :  { %986 = vmatprep.subr.bf16.mxu0 %v2210_v11  ;;  %1027 = vmatprep.subr.bf16.mxu1 %v2212_v15  ;;  %v2461_v11 = vld [vmem:[#allocation6 + $0xf0] sm:$0xff]   ;;  %v2464_v15 = vld [vmem:[#allocation6 + $0x68] sm:$0xff]  }
  0x9a   :  { %987 = vmatpush2.bf16.msra.mxu0 %v2209_v16  ;;  %1028 = vmatpush2.bf16.msra.mxu1 %v2211_v19  ;;  %v2465_v16 = vld [vmem:[#allocation6 + $0xe8] sm:$0xff]   ;;  %v2468_v19 = vld [vmem:[#allocation6 + $0x60] sm:$0xff]  }
  0x9b   :  { %988 = vmatprep.subr.bf16.mxu0 %v2202_v20  ;;  %1029 = vmatprep.subr.bf16.mxu1 %v2204_v53  ;;  %v2469_v20 = vld [vmem:[#allocation6 + $0xe0] sm:$0xff]   ;;  %v2473_v53 = vld [vmem:[#allocation6 + $0xd8] sm:$0xff]  }
  0x9e   :  { %989 = vmatpush2.bf16.msra.mxu0 %v2201_v23  ;;  %1030 = vmatpush2.bf16.msra.mxu1 %v2203_v26  ;;  %v2474_v23 = vld [vmem:[#allocation6 + $0x18] sm:$0xff]   ;;  %v2477_v26 = vld [vmem:[#allocation6 + $0xd0] sm:$0xff]  }
  0x9f   :  { %990 = vmatprep.subr.bf16.mxu0 %v2194_v27  ;;  %1031 = vmatprep.subr.bf16.mxu1 %v2196_v30  ;;  %v2478_v27 = vld [vmem:[#allocation6 + $0x10] sm:$0xff]   ;;  %v2481_v30 = vld [vmem:[#allocation6 + $0xc8] sm:$0xff]  }
  0xa2   :  { %991 = vmatpush2.bf16.msra.mxu0 %v2193_v31  ;;  %1032 = vmatpush2.bf16.msra.mxu1 %v2195_v32  ;;  %v2482_v31 = vld [vmem:[#allocation6 + $0x8] sm:$0xff]  }
  0xa3   :  { %992 = vmatprep.subr.bf16.mxu0 %v2186_v33  ;;  %1033 = vmatprep.subr.bf16.mxu1 %v2188_v34  ;;  %v2483_v32 = vld [vmem:[#allocation6 + $0x88] sm:$0xff]   ;;  %v2484_v33 = vld [vmem:[#allocation6 + $0x40] sm:$0xff]  }
  0xa4   :  { %v2485_v34 = vld [vmem:[#allocation6 + $0xc0] sm:$0xff]  }
  0xa6   :  { %993 = vmatpush2.bf16.msra.mxu0 %v2185_v39  ;;  %1034 = vmatpush2.bf16.msra.mxu1 %v2187_v40  ;;  %v1081_v39 = vlaneseq }
  0xa7   :  { %994 = vmatprep.subr.bf16.mxu0 %v2178_v41  ;;  %1035 = vmatprep.subr.bf16.mxu1 %v2180_v57  ;;  %v2781_v57 = vld [vmem:[%s2815_s2] sm:$0xff] }
  0xa8   :  { %v2775_v40 = vshrl.u32 %v1081_v39, 7 }
  0xaa   :  { %995 = vmatpush2.bf16.msra.mxu0 %v2177_v46  ;;  %1036 = vmatpush2.bf16.msra.mxu1 %v2179_v47  ;;  %v1083_v41 = vsub.s32 0, %v2775_v40  ;;  %v1091_v42 = vsub.s32 2, %v2775_v40  ;;  %v1087_v43 = vsub.s32 1, %v2775_v40  ;;  %v1095_v44 = vsub.s32 3, %v2775_v40 }
  0xab   :  { %996 = vmatprep.subr.bf16.mxu0 %v2170_v48  ;;  %1037 = vmatprep.subr.bf16.mxu1 %v2172_v49  ;;  %v1111_v39 = vsub.s32 7, %v2775_v40 }
  0xac   :  { %v1084_v45 = vrot.slane %v2781_v57, %v1083_v41  ;;  %v1092_v46 = vrot.slane %v2781_v57, %v1091_v42  ;;  %v1088_v47 = vrot.slane %v2781_v57, %v1087_v43  ;;  %v1096_v49 = vrot.slane %v2781_v57, %v1095_v44 }
  0xae   :  { %997 = vmatpush2.bf16.msra.mxu0 %v2169_v55  ;;  %1038 = vmatpush2.bf16.msra.mxu1 %v2171_v56 }
  0xaf   :  { %998 = vmatprep.subr.bf16.mxu0 %v2162_v58  ;;  %1039 = vmatprep.subr.bf16.mxu1 %v2164_v59 }
  0xb2   :  { %999 = vmatpush2.bf16.msra.mxu0 %v2161_v0  ;;  %1040 = vmatpush2.bf16.msra.mxu1 %v2163_v1 }
  0xb3   :  { %1000 = vmatprep.subr.bf16.mxu0 %v2154_v2  ;;  %1041 = vmatprep.subr.bf16.mxu1 %v2156_v3 }
  0xb6   :  { %1001 = vmatpush2.bf16.msra.mxu0 %v2153_v4  ;;  %1042 = vmatpush2.bf16.msra.mxu1 %v2155_v5  ;;  %v2490_v5 = vld [vmem:[#allocation6 + $0x138] sm:$0xff]  }
  0xb7   :  { %2296 = vmatprep.subr.bf16.mxu0 %v2456_v6  ;;  %2318 = vmatprep.subr.bf16.mxu1 %v2457_v7 }
  0xb9   :  { %1003 = vmatmul.mubr.bf16.vlgmr.msra.gmra.mxu0 %v2767_v13  ;;  %1044 = vmatmul.mubr.bf16.vlgmr.msra.gmra.mxu1 %v2767_v13  ;;  %v2471_v13 = vld [vmem:[#allocation6 + $0xa0] sm:$0xff]  }
  0xba   :  { %2297 = vmatpush3.bf16.msra.mxu0 %v2458_v8  ;;  %2319 = vmatpush3.bf16.msra.mxu1 %v2459_v9  ;;  %v2491_v8 = vld [vmem:[#allocation6 + $0x1b8] sm:$0xff]   ;;  %v2492_v9 = vld [vmem:[#allocation6 + $0x170] sm:$0xff]  }
  0xbb   :  { %2298 = vmatprep.subr.bf16.mxu0 %v2460_v10  ;;  %2320 = vmatprep.subr.bf16.mxu1 %v2461_v11  ;;  %v2493_v10 = vld [vmem:[#allocation6 + $0x1f0] sm:$0xff]  }
  0xbc   :  { %v2494_v11 = vld [vmem:[#allocation6 + $0x130] sm:$0xff]  }
  0xbe   :  { %2299 = vmatpush3.bf16.msra.mxu0 %v2462_v12  ;;  %2321 = vmatpush3.bf16.msra.mxu1 %v2463_v14  ;;  %v2495_v12 = vld [vmem:[#allocation6 + $0x1b0] sm:$0xff]   ;;  %v2496_v14 = vld [vmem:[#allocation6 + $0x168] sm:$0xff]  }
  0xbf   :  { %2300 = vmatprep.subr.bf16.mxu0 %v2464_v15  ;;  %2322 = vmatprep.subr.bf16.mxu1 %v2465_v16  ;;  %v2497_v15 = vld [vmem:[#allocation6 + $0x1e8] sm:$0xff]  }
  0xc0   :  { %v2498_v16 = vld [vmem:[#allocation6 + $0x128] sm:$0xff]  }
  0xc2   :  { %2301 = vmatpush3.bf16.msra.mxu0 %v2466_v17  ;;  %2323 = vmatpush3.bf16.msra.mxu1 %v2467_v18  ;;  %v2499_v17 = vld [vmem:[#allocation6 + $0x1a8] sm:$0xff]   ;;  %v2500_v18 = vld [vmem:[#allocation6 + $0x160] sm:$0xff]  }
  0xc3   :  { %2302 = vmatprep.subr.bf16.mxu0 %v2468_v19  ;;  %2324 = vmatprep.subr.bf16.mxu1 %v2469_v20  ;;  %v2501_v19 = vld [vmem:[#allocation6 + $0x1e0] sm:$0xff]  }
  0xc4   :  { %v2502_v20 = vld [vmem:[#allocation6 + $0x120] sm:$0xff]  }
  0xc6   :  { %2303 = vmatpush3.bf16.msra.mxu0 %v2470_v21  ;;  %2325 = vmatpush3.bf16.msra.mxu1 %v2471_v13  ;;  %v2503_v21 = vld [vmem:[#allocation6 + $0x1a0] sm:$0xff]   ;;  %v2504_v13 = vld [vmem:[#allocation6 + $0x158] sm:$0xff]  }
  0xc7   :  { %2304 = vmatprep.subr.bf16.mxu0 %v2472_v22  ;;  %2326 = vmatprep.subr.bf16.mxu1 %v2473_v53  ;;  %v2505_v22 = vld [vmem:[#allocation6 + $0x1d8] sm:$0xff]  }
  0xc8   :  { %v2506_v53 = vld [vmem:[#allocation6 + $0x118] sm:$0xff]  }
  0xca   :  { %2305 = vmatpush3.bf16.msra.mxu0 %v2474_v23  ;;  %2327 = vmatpush3.bf16.msra.mxu1 %v2475_v24  ;;  %v2507_v23 = vld [vmem:[#allocation6 + $0x198] sm:$0xff]   ;;  %v2508_v24 = vld [vmem:[#allocation6 + $0x150] sm:$0xff]  }
  0xcb   :  { %2306 = vmatprep.subr.bf16.mxu0 %v2476_v25  ;;  %2328 = vmatprep.subr.bf16.mxu1 %v2477_v26  ;;  %v2509_v25 = vld [vmem:[#allocation6 + $0x1d0] sm:$0xff]  }
  0xcc   :  { %v2510_v26 = vld [vmem:[#allocation6 + $0x110] sm:$0xff]  }
  0xce   :  { %2307 = vmatpush3.bf16.msra.mxu0 %v2478_v27  ;;  %2329 = vmatpush3.bf16.msra.mxu1 %v2479_v28  ;;  %v2511_v27 = vld [vmem:[#allocation6 + $0x190] sm:$0xff]   ;;  %v2512_v28 = vld [vmem:[#allocation6 + $0x148] sm:$0xff]  }
  0xcf   :  { %2308 = vmatprep.subr.bf16.mxu0 %v2480_v29  ;;  %2330 = vmatprep.subr.bf16.mxu1 %v2481_v30  ;;  %v2513_v29 = vld [vmem:[#allocation6 + $0x1c8] sm:$0xff]  }
  0xd0   :  { %v2514_v30 = vld [vmem:[#allocation6 + $0x108] sm:$0xff]  }
  0xd2   :  { %2309 = vmatpush3.bf16.msra.mxu0 %v2482_v31  ;;  %2331 = vmatpush3.bf16.msra.mxu1 %v2483_v32  ;;  %v2515_v31 = vld [vmem:[#allocation6 + $0x188] sm:$0xff]   ;;  %v2516_v32 = vld [vmem:[#allocation6 + $0x140] sm:$0xff]  }
  0xd3   :  { %2310 = vmatprep.subr.bf16.mxu0 %v2484_v33  ;;  %2332 = vmatprep.subr.bf16.mxu1 %v2485_v34  ;;  %v2517_v33 = vld [vmem:[#allocation6 + $0x1c0] sm:$0xff]  }
  0xd4   :  { %v2518_v34 = vld [vmem:[#allocation6 + $0x100] sm:$0xff]  }
  0xd6   :  { %2311 = vmatpush3.bf16.msra.mxu0 %v2486_v35  ;;  %2333 = vmatpush3.bf16.msra.mxu1 %v2487_v36  ;;  %v2519_v35 = vld [vmem:[#allocation6 + $0x180] sm:$0xff]   ;;  %v1099_v36 = vsub.s32 4, %v2775_v40 }
  0xd7   :  { %2340 = vmatprep.subr.bf16.mxu0 %v2488_v37  ;;  %2362 = vmatprep.subr.bf16.mxu1 %v2489_v38  ;;  %v1107_v37 = vsub.s32 6, %v2775_v40  ;;  %v1103_v38 = vsub.s32 5, %v2775_v40 }
  0xd8   :  { %v1100_v41 = vrot.slane %v2781_v57, %v1099_v36 }
  0xd9   :  { %v1108_v42 = vrot.slane %v2781_v57, %v1107_v37  ;;  %v1104_v43 = vrot.slane %v2781_v57, %v1103_v38 }
 0x139   :  { %v922_v48 = vpop.f32.mrf.mxu0  ;;  %v963_v51 = vpop.f32.mrf.mxu1 }
 0x13a   :  { %v1121_v50 = vadd.f32 %v1084_v45, %v922_v48  ;;  %v1123_v52 = vadd.f32 %v1092_v46, %v963_v51  ;;  %v1112_v45 = vrot.slane %v2781_v57, %v1111_v39  ;;  %v2520_v57 = vld [vmem:[#allocation8 + $0x38] sm:$0xff]  }
 0x13b   :  { %v924_v54 = vpop.f32.mrf.mxu0  ;;  %v965_v56 = vpop.f32.mrf.mxu1 }
 0x13c   :  { %v1122_v55 = vadd.f32 %v1088_v47, %v924_v54  ;;  %v1129_v58 = vmax.f32 %v1121_v50, 0.0  ;;  %v1131_v59 = vmax.f32 %v1123_v52, 0.0  ;;  %v1124_v60 = vadd.f32 %v1096_v49, %v965_v56 }
 0x13d   :  { %v926_v61 = vpop.f32.mrf.mxu0  ;;  %v967_v63 = vpop.f32.mrf.mxu1 }
 0x13e   :  { %v1130_v62 = vmax.f32 %v1122_v55, 0.0  ;;  %v1132_v0 = vmax.f32 %v1124_v60, 0.0  ;;  %v1139_v2 = vpack.c.bf16 %v1131_v59, %v1131_v59  ;;  %v1137_v6 = vpack.c.bf16 %v1129_v58, %v1129_v58 }
 0x13f   :  { %v927_v1 = vpop.f32.mrf.mxu0  ;;  %v968_v4 = vpop.f32.mrf.mxu1 }
 0x140   :  { %v1138_v3 = vpack.c.bf16 %v1130_v62, %v1130_v62  ;;  %v1140_v7 = vpack.c.bf16 %v1132_v0, %v1132_v0  ;;  %v2522_v4 = vld [vmem:[#allocation8 + $0x28] sm:$0xff]  }
 0x142   :  { %1696 = vmatprep.mubr.bf16.mxu0 %v1138_v3  ;;  %1736 = vmatprep.mubr.bf16.mxu1 %v1140_v7  ;;  %v2521_v3 = vld [vmem:[#allocation8 + $0x30] sm:$0xff]  }
 0x143   :  { %1697 = vmatmul.mubr.bf16.vlgmr.msra.gmra.mxu0 %v1137_v6  ;;  %1737 = vmatmul.mubr.bf16.vlgmr.msra.gmra.mxu1 %v1139_v2  ;;  %v2674_v2 = vmov 0.0   ;;  %v2524_v6 = vld [vmem:[#allocation8 + $0x18] sm:$0xff]   ;;  %v2525_v7 = vld [vmem:[#allocation8 + $0x10] sm:$0xff]  }
 0x144   :  { %2341 = vmatpush3.bf16.msra.mxu0 %v2490_v5  ;;  %2363 = vmatpush3.bf16.msra.mxu1 %v2491_v8  ;;  %v2523_v5 = vld [vmem:[#allocation8 + $0x20] sm:$0xff]   ;;  %v2526_v8 = vld [vmem:[#allocation8 + $0x8] sm:$0xff]  }
 0x145   :  { %2342 = vmatprep.subr.bf16.mxu0 %v2492_v9  ;;  %2364 = vmatprep.subr.bf16.mxu1 %v2493_v10  ;;  %v2527_v9 = vld [vmem:[#allocation8] sm:$0xff]   ;;  %v2528_v10 = vld [vmem:[#allocation9 + $0x38] sm:$0xff]  }
 0x148   :  { %2343 = vmatpush3.bf16.msra.mxu0 %v2494_v11  ;;  %2365 = vmatpush3.bf16.msra.mxu1 %v2495_v12  ;;  %v2529_v11 = vld [vmem:[#allocation9 + $0x30] sm:$0xff]   ;;  %v2530_v12 = vld [vmem:[#allocation9 + $0x28] sm:$0xff]  }
 0x149   :  { %2344 = vmatprep.subr.bf16.mxu0 %v2496_v14  ;;  %2366 = vmatprep.subr.bf16.mxu1 %v2497_v15  ;;  %v2531_v14 = vld [vmem:[#allocation9 + $0x20] sm:$0xff]   ;;  %v2532_v15 = vld [vmem:[#allocation9 + $0x18] sm:$0xff]  }
 0x14c   :  { %2345 = vmatpush3.bf16.msra.mxu0 %v2498_v16  ;;  %2367 = vmatpush3.bf16.msra.mxu1 %v2499_v17  ;;  %v2533_v16 = vld [vmem:[#allocation9 + $0x10] sm:$0xff]   ;;  %v2534_v17 = vld [vmem:[#allocation9 + $0x8] sm:$0xff]  }
 0x14d   :  { %2346 = vmatprep.subr.bf16.mxu0 %v2500_v18  ;;  %2368 = vmatprep.subr.bf16.mxu1 %v2501_v19 }
 0x150   :  { %2347 = vmatpush3.bf16.msra.mxu0 %v2502_v20  ;;  %2369 = vmatpush3.bf16.msra.mxu1 %v2503_v21 }
 0x151   :  { %2348 = vmatprep.subr.bf16.mxu0 %v2504_v13  ;;  %2370 = vmatprep.subr.bf16.mxu1 %v2505_v22 }
 0x154   :  { %2349 = vmatpush3.bf16.msra.mxu0 %v2506_v53  ;;  %2371 = vmatpush3.bf16.msra.mxu1 %v2507_v23 }
 0x155   :  { %2350 = vmatprep.subr.bf16.mxu0 %v2508_v24  ;;  %2372 = vmatprep.subr.bf16.mxu1 %v2509_v25  ;;  %v2213_v25 = vld [vmem:[%s2817_s4] ss:$0 sm:$0xff] }
 0x158   :  { %2351 = vmatpush3.bf16.msra.mxu0 %v2510_v26  ;;  %2373 = vmatpush3.bf16.msra.mxu1 %v2511_v27 }
 0x159   :  { %2352 = vmatprep.subr.bf16.mxu0 %v2512_v28  ;;  %2374 = vmatprep.subr.bf16.mxu1 %v2513_v29 }
 0x15c   :  { %2353 = vmatpush3.bf16.msra.mxu0 %v2514_v30  ;;  %2375 = vmatpush3.bf16.msra.mxu1 %v2515_v31 }
 0x15d   :  { %2354 = vmatprep.subr.bf16.mxu0 %v2516_v32  ;;  %2376 = vmatprep.subr.bf16.mxu1 %v2517_v33 }
 0x160   :  { %2355 = vmatpush3.bf16.msra.mxu0 %v2518_v34  ;;  %2377 = vmatpush3.bf16.msra.mxu1 %v2519_v35 }
 0x161   :  { %2402 = vmatprep.subr.bf16.mxu0 %v2674_v2  ;;  %2422 = vmatprep.subr.bf16.mxu1 %v2674_v2 }
 0x179   :  { %v1004_v44 = vpop.f32.mrf.mxu0  ;;  %v1045_v47 = vpop.f32.mrf.mxu1 }
 0x17a   :  { %v1125_v46 = vadd.f32 %v1100_v41, %v1004_v44  ;;  %v1127_v48 = vadd.f32 %v1108_v42, %v1045_v47  ;;  %v2535_v44 = vld [vmem:[#allocation9] sm:$0xff]  }
 0x17b   :  { %v1006_v49 = vpop.f32.mrf.mxu0  ;;  %v1047_v51 = vpop.f32.mrf.mxu1 }
 0x17c   :  { %v1126_v50 = vadd.f32 %v1104_v43, %v1006_v49  ;;  %v1133_v52 = vmax.f32 %v1125_v46, 0.0  ;;  %v1135_v54 = vmax.f32 %v1127_v48, 0.0  ;;  %v1128_v55 = vadd.f32 %v1112_v45, %v1047_v51  ;;  %v2278_v45 = vld [vmem:[%s2819_s6] ss:$0 sm:$0xff] }
 0x17d   :  { %v1008_v56 = vpop.f32.mrf.mxu0  ;;  %v1049_v58 = vpop.f32.mrf.mxu1 }
 0x17e   :  { %v1134_v40 = vmax.f32 %v1126_v50, 0.0  ;;  %v1136_v59 = vmax.f32 %v1128_v55, 0.0  ;;  %v1143_v61 = vpack.c.bf16 %v1135_v54, %v1135_v54  ;;  %v1141_v0 = vpack.c.bf16 %v1133_v52, %v1133_v52 }
 0x17f   :  { %v1009_v60 = vpop.f32.mrf.mxu0  ;;  %v1050_v63 = vpop.f32.mrf.mxu1 }
 0x180   :  { %v1142_v62 = vpack.c.bf16 %v1134_v40, %v1134_v40  ;;  %v1144_v1 = vpack.c.bf16 %v1136_v59, %v1136_v59 }
 0x182   :  { %1776 = vmatprep.mubr.bf16.mxu0 %v1142_v62  ;;  %1816 = vmatprep.mubr.bf16.mxu1 %v1144_v1 }
 0x183   :  { %1777 = vmatmul.mubr.bf16.vlgmr.msra.gmra.mxu0 %v1141_v0  ;;  %1817 = vmatmul.mubr.bf16.vlgmr.msra.gmra.mxu1 %v1143_v61 }
 0x184   :  { %2403 = vmatpush3.bf16.msra.mxu0 %v2520_v57  ;;  %2418 = vmatprep.mubr.msk.bf16.mxu0 %vm2675_vm0, %v2674_v2 }
 0x185   :  { %2404 = vmatprep.subr.bf16.mxu0 %v2674_v2  ;;  %2438 = vmatprep.mubr.msk.bf16.mxu1 %vm2675_vm0, %v2674_v2 }
 0x186   :  { %2423 = vmatpush3.bf16.msra.mxu1 %v2528_v10 }
 0x187   :  { %2424 = vmatprep.subr.bf16.mxu1 %v2674_v2 }
 0x188   :  { %2405 = vmatpush3.bf16.msra.mxu0 %v2521_v3 }
 0x189   :  { %2406 = vmatprep.subr.bf16.mxu0 %v2674_v2 }
 0x18a   :  { %2425 = vmatpush3.bf16.msra.mxu1 %v2529_v11 }
 0x18b   :  { %2426 = vmatprep.subr.bf16.mxu1 %v2674_v2 }
 0x18c   :  { %2407 = vmatpush3.bf16.msra.mxu0 %v2522_v4 }
 0x18d   :  { %2408 = vmatprep.subr.bf16.mxu0 %v2674_v2 }
 0x18e   :  { %2427 = vmatpush3.bf16.msra.mxu1 %v2530_v12 }
 0x18f   :  { %2428 = vmatprep.subr.bf16.mxu1 %v2674_v2 }
 0x190   :  { %2409 = vmatpush3.bf16.msra.mxu0 %v2523_v5 }
 0x191   :  { %2410 = vmatprep.subr.bf16.mxu0 %v2674_v2 }
 0x192   :  { %2429 = vmatpush3.bf16.msra.mxu1 %v2531_v14 }
 0x193   :  { %2430 = vmatprep.subr.bf16.mxu1 %v2674_v2 }
 0x194   :  { %2411 = vmatpush3.bf16.msra.mxu0 %v2524_v6 }
 0x195   :  { %2412 = vmatprep.subr.bf16.mxu0 %v2674_v2 }
 0x196   :  { %2431 = vmatpush3.bf16.msra.mxu1 %v2532_v15 }
 0x197   :  { %2432 = vmatprep.subr.bf16.mxu1 %v2674_v2 }
 0x198   :  { %2413 = vmatpush3.bf16.msra.mxu0 %v2525_v7 }
 0x199   :  { %2414 = vmatprep.subr.bf16.mxu0 %v2674_v2 }
 0x19a   :  { %2433 = vmatpush3.bf16.msra.mxu1 %v2533_v16 }
 0x19b   :  { %2434 = vmatprep.subr.bf16.mxu1 %v2674_v2 }
 0x19c   :  { %2415 = vmatpush3.bf16.msra.mxu0 %v2526_v8 }
 0x19d   :  { %2416 = vmatprep.subr.bf16.mxu0 %v2674_v2 }
 0x19e   :  { %2435 = vmatpush3.bf16.msra.mxu1 %v2534_v17 }
 0x19f   :  { %2436 = vmatprep.subr.bf16.mxu1 %v2674_v2 }
 0x1a0   :  { %2417 = vmatpush3.bf16.msra.mxu0 %v2527_v9 }
 0x1a2   :  { %2437 = vmatpush3.bf16.msra.mxu1 %v2535_v44 }
 0x203   :  { %v2312_v18 = vpop.f32.mrf.mxu0  ;;  %v2334_v19 = vpop.f32.mrf.mxu1 }
 0x205   :  { %v2313_v20 = vpop.f32.mrf.mxu0  ;;  %v2335_v21 = vpop.f32.mrf.mxu1 }
 0x206   :  { %v2314_v24 = vadd.f32 %v2313_v20, %v2312_v18  ;;  %v2336_v28 = vadd.f32 %v2335_v21, %v2334_v19 }
 0x207   :  { %v2315_v13 = vpop.f32.mrf.mxu0  ;;  %v2337_v22 = vpop.f32.mrf.mxu1 }
 0x208   :  { %v1699_v26 = vadd.f32 %v2314_v24, %v2213_v25 }
 0x209   :  { %v2316_v53 = vpop.f32.mrf.mxu0  ;;  %v2338_v23 = vpop.f32.mrf.mxu1 }
 0x20a   :  { %v1739_v31 = vadd.f32 %v2336_v28, %v1699_v26 }
 0x243   :  { %v2356_v27 = vpop.f32.mrf.mxu0  ;;  %v2378_v29 = vpop.f32.mrf.mxu1 }
 0x245   :  { %v2357_v30 = vpop.f32.mrf.mxu0  ;;  %v2379_v33 = vpop.f32.mrf.mxu1 }
 0x246   :  { %v2358_v32 = vadd.f32 %v2357_v30, %v2356_v27  ;;  %v2380_v36 = vadd.f32 %v2379_v33, %v2378_v29 }
 0x247   :  { %v2359_v34 = vpop.f32.mrf.mxu0  ;;  %v2381_v37 = vpop.f32.mrf.mxu1 }
 0x248   :  { %v1779_v35 = vadd.f32 %v2358_v32, %v1739_v31 }
 0x249   :  { %v2360_v38 = vpop.f32.mrf.mxu0  ;;  %v2382_v41 = vpop.f32.mrf.mxu1 }
 0x24a   :  { %v1819_v39 = vadd.f32 %v2380_v36, %v1779_v35 }
 0x24c   :  { %v1824_v42 = vmax.f32 %v1819_v39, 0.0 }
 0x24e   :  { %v1825_v43 = vpack.c.bf16 %v1824_v42, %v1824_v42 }
 0x250   :  { %2419 = vmatmul.mubr.bf16.vlgmr.msra.gmra.mxu0 %v1825_v43 }
 0x310   :  { %v1931_v46 = vpop.f32.mrf.mxu0 }
 0x311   :  { %v1932_v47 = vadd.f32 %v2278_v45, %v1931_v46 }
 0x312   :  { %v2420_v48 = vpop.f32.mrf.mxu0 }
 0x313   :  { %v1938_v49 = vpack.c.bf16 %v1932_v47, %v1932_v47  ;;  %1937 = vst [vmem:[#allocation11] sm:$0xff] %v1932_v47 }
 0x314   :  { %v1934_v50 = vpop.f32.mrf.mxu0 }
 0x315   :  { %2439 = vmatmul.mubr.bf16.vlgmr.msra.gmra.mxu1 %v1938_v49 }
 0x316   :  { %v2421_v51 = vpop.f32.mrf.mxu0 }
 0x317   :  { %2627 = shalt.err (!%p2624_p10)
}
 0x318   :  { %2061 = dma.vmem_to_hbm [thread:$0]  %s2059_s19, 128, %s2822_s9, [#allocation5]   ;;  %v2287_v52 = vld [vmem:[%s2821_s8] ss:$0 sm:$0xff] }
 0x319   :  { %s2677_s24 = smov [#allocation12]  }
 0x31a   :  { %s2068_s25 = sshll.u32 %s2677_s24, 4  ;;  %s2069_s25 = int_to_ptr.vmem [resolvable:$true] %s2068_s25 }
 0x31b   :  { %s2636_s26 = scalar_lea.vmem %s2069_s25, 128  ;;  %p2641_p12 = scmp.lt.s32.totalorder %s2069_s25, %s2069_s25 }
 0x31c   :  { %p2637_p11 = scmp.ne.s32.totalorder %s2069_s25, %s2636_s26  ;;  %p2642_p13 = scmp.lt.s32.totalorder %s2636_s26, %s2636_s26 }
 0x31e   :  { %p2643_p0 = por %p2642_p13, %p2641_p12 }
 0x320   :  { %p2644_p1 = pnand %p2643_p0, %p2637_p11 }
 0x3d5   :  { %v2044_v54 = vpop.f32.mrf.mxu1 }
 0x3d6   :  { %v2045_v55 = vadd.f32 %v2287_v52, %v2044_v54 }
 0x3d7   :  { %v2440_v56 = vpop.f32.mrf.mxu1 }
 0x3d8   :  { %v2050_v40 = vmax.f32 %v2045_v55, 0.0 }
 0x3d9   :  { %v2047_v58 = vpop.f32.mrf.mxu1 }
 0x3da   :  { %2051 = vst [vmem:[#allocation12] sm:$0xff] %v2050_v40 }
 0x3db   :  { %v2441_v59 = vpop.f32.mrf.mxu1 }
 0x3dc   :  { %2647 = shalt.err (!%p2644_p1)
}
 0x3dd   :  { %2071 = dma.vmem_to_hbm [thread:$0]  %s2069_s25, 128, %s2823_s10, [#allocation13]  }
 0x3de   :  { %2662 = dma.done.wait [#allocation5], 128  }
 0x3df   :  { %2663 = vsyncadd [#allocation5], 4294967168 }
 0x3e0   :  { %2664 = dma.done.wait [#allocation13], 128  }
 0x3e1   :  { %2665 = vsyncadd [#allocation13], 4294967168 }
 0x3e2   :  { %2078 = vsyncpa [#allocation4], 1 }
 0x3e3   :  { %2079 = vsyncpa [#allocation7], 1 }
 0x3e4   :  { %2080 = vsyncpa [#allocation10], 1 }
 0x3e5   :  { %2081 = vsyncpa [#allocation5], 1 }
 0x3e6   :  { %2082 = vsyncpa [#allocation13], 1 }

</bundles_post_ra>
